<compile_context>
chip_gen: v7x
topology: tpu7x:2x2x1
jax: 0.10.0
libtpu: 0.0.40
codegen_flags: <defaults>
</compile_context>

<pallas_src>
import jax
import jax.numpy as jnp
from jax.experimental import pallas as pl
from jax.experimental.pallas import tpu as pltpu


def _round_up(n, m):
    return ((n + m - 1) // m) * m


def _leaky_relu(x, slope=0.2):
    # single max + mul on the VPU (no compare+select)
    return jnp.maximum(x, slope * x)


def disc_wass_kernel(x_ref,
                     w1_ref, b1_ref,
                     w2_ref, b2_ref,
                     w3_ref, b3_ref,
                     w4_ref, b4_ref,
                     o_ref):
    # x block: (TBP, pack*input_size) -- `pack` original rows per packed row,
    # so vreg lanes are dense even for 32-wide feature dims.  All weights /
    # biases are VMEM-resident across grid steps (constant index_map).
    x = x_ref[...]

    # Layers 1-3 on the MXU with f32 accumulation.  Operands follow the weight
    # dtype (f32 or bf16); casting the just-loaded activations is a cheap VPU
    # pack hidden under the MXU, so the wrapper never re-writes x in HBM.
    h = jnp.dot(x.astype(w1_ref.dtype), w1_ref[...],
                preferred_element_type=jnp.float32) + b1_ref[...]
    h = _leaky_relu(h)

    h = jnp.dot(h.astype(w2_ref.dtype), w2_ref[...],
                preferred_element_type=jnp.float32) + b2_ref[...]
    h = _leaky_relu(h)

    h = jnp.dot(h.astype(w3_ref.dtype), w3_ref[...],
                preferred_element_type=jnp.float32) + b3_ref[...]
    h = _leaky_relu(h)

    # Output layer: block-diagonal (pack*hs3, pack) weight, kept f32 for
    # accuracy.  Result (TBP, pack) is the original (tb, 1) column, packed.
    out = jnp.dot(h, w4_ref[...], preferred_element_type=jnp.float32)
    out = out + b4_ref[...]
    o_ref[...] = out.astype(o_ref.dtype)


def discriminator_wass_forward(x, params, *, block_b=4096, matmul_dtype=None):
    """x: (B, input_size) -> (B, 1) float32.

    params: ((w1,b1),(w2,b2),(w3,b3),(w4,b4)) with w_i (in, out), b_i (1, out).
    block_b: max batch tile (rows of x per grid step).  Large tiles (2048-8192)
             amortize per-step overhead; the wrapper also keeps >= ~4 grid
             steps when the batch allows so v7x can use both TensorCores.
    matmul_dtype: e.g. jnp.bfloat16 to feed bf16 to the MXU.  Beneficial on
             v5e, v6e and v7x (bias adds / LeakyReLU / final reduction stay
             f32).  Only the tiny weights are cast in the wrapper; x is cast
             inside the kernel to avoid extra HBM traffic.
    """
    (w1, b1), (w2, b2), (w3, b3), (w4, b4) = params
    B, in_dim = x.shape
    hs1, hs2, hs3 = w1.shape[1], w2.shape[1], w3.shape[1]

    # ---- lane packing: pack `pack` original rows per packed row ------------
    max_dim = max(in_dim, hs1, hs2, hs3)
    pack = max(1, 128 // max_dim)

    def block_diag(w):
        return w if pack == 1 else jnp.kron(jnp.eye(pack, dtype=w.dtype), w)

    def tile_bias(b):
        b = b.reshape(1, -1)
        return b if pack == 1 else jnp.tile(b, (1, pack))

    w4_mat = w4.reshape(hs3, 1)
    w1p, w2p, w3p, w4p = (block_diag(w) for w in (w1, w2, w3, w4_mat))
    b1p, b2p, b3p, b4p = (tile_bias(b) for b in (b1, b2, b3, b4))

    if matmul_dtype is not None:
        # cast only the (tiny) matmul weights; x stays in its HBM dtype and is
        # cast in-kernel (avoids the wrapper-precompute anti-pattern)
        w1p = w1p.astype(matmul_dtype)
        w2p = w2p.astype(matmul_dtype)
        w3p = w3p.astype(matmul_dtype)
        # w4p and all biases stay f32

    # ---- batch tiling -------------------------------------------------------
    unit = 8 * pack                              # min tile: 8 packed sublanes
    tb = min(block_b, _round_up(B, unit))
    tb = max(unit, (tb // unit) * unit)
    # keep >= ~4 grid steps when the batch allows (v7x megacore; harmless on
    # v5e/v6e which have a single TensorCore)
    tb = min(tb, max(unit, _round_up(-(-B // 4), unit)))

    Bp = _round_up(B, tb)
    if Bp != B:
        x = jnp.pad(x, ((0, Bp - B), (0, 0)))

    # contiguous row-major reshape -> pure relabeling, no HBM copy
    x_packed = x.reshape(Bp // pack, pack * in_dim)
    tbp = tb // pack
    grid = (Bp // tb,)

    def resident(arr):
        # full-array block, same block index every step -> stays in VMEM
        return pl.BlockSpec(arr.shape, lambda i: (0, 0))

    # generous VMEM estimate: double-buffered x/out blocks + resident params +
    # live f32 intermediates.  Raises v5e's 16 MiB default when needed, never
    # above v7x's 64 MiB physical budget.
    x_bytes = x.dtype.itemsize
    param_bytes = sum(int(a.size) * a.dtype.itemsize
                      for a in (w1p, b1p, w2p, b2p, w3p, b3p, w4p, b4p))
    est = (2 * tb * in_dim * x_bytes      # x blocks (double-buffered)
           + 2 * tb * 4                   # out blocks (double-buffered)
           + 2 * param_bytes              # resident weights / biases
           + 8 * tb * max_dim * 4)        # live activations + cast copies
    vmem_limit = min(64 * 1024 * 1024, max(int(est), 16 * 1024 * 1024))

    out = pl.pallas_call(
        disc_wass_kernel,
        out_shape=jax.ShapeDtypeStruct((Bp // pack, pack), jnp.float32),
        grid=grid,
        in_specs=[
            pl.BlockSpec((tbp, pack * in_dim), lambda i: (i, 0)),  # x: per step
            resident(w1p), resident(b1p),
            resident(w2p), resident(b2p),
            resident(w3p), resident(b3p),
            resident(w4p), resident(b4p),
        ],
        out_specs=pl.BlockSpec((tbp, pack), lambda i: (i, 0)),
        compiler_params=pltpu.CompilerParams(
            dimension_semantics=("parallel",),
            vmem_limit_bytes=vmem_limit),
    )(x_packed, w1p, b1p, w2p, b2p, w3p, b3p, w4p, b4p)

    # packed (Bp/pack, pack) rows are the original rows in row-major order
    return out.reshape(Bp, 1)[:B]


def init_linear(key, fan_in, fan_out):
    """PyTorch nn.Linear default init (U[-1/sqrt(in), 1/sqrt(in)]).
    Weight stored as (in_features, out_features); bias as (1, out_features)."""
    kw, kb = jax.random.split(key)
    bound = 1.0 / (fan_in ** 0.5)
    w = jax.random.uniform(kw, (fan_in, fan_out), jnp.float32, -bound, bound)
    b = jax.random.uniform(kb, (1, fan_out), jnp.float32, -bound, bound)
    return w, b


def reference_forward(x, params):
    (w1, b1), (w2, b2), (w3, b3), (w4, b4) = params
    h = x @ w1 + b1
    h = jnp.maximum(h, 0.2 * h)
    h = h @ w2 + b2
    h = jnp.maximum(h, 0.2 * h)
    h = h @ w3 + b3
    h = jnp.maximum(h, 0.2 * h)
    return h @ w4 + b4


if __name__ == "__main__":
    # Shapes consistent with the module: batch=8, input_size=32,
    # hs1=hs2=hs3=32, output dim = 1.
    B, input_size, hs1, hs2, hs3 = 8, 32, 32, 32, 32

    key = jax.random.PRNGKey(0)
    kx, k1, k2, k3, k4, kx2, kx3, k5, k6, k7, k8 = jax.random.split(key, 11)

    x = jax.random.normal(kx, (B, input_size), jnp.float32)
    params = (
        init_linear(k1, input_size, hs1),
        init_linear(k2, hs1, hs2),
        init_linear(k3, hs2, hs3),
        init_linear(k4, hs3, 1),
    )

    # 1) f32 path at the module's small shape (single grid step, pack=4)
    out = discriminator_wass_forward(x, params)
    out = jax.block_until_ready(out)
    ref = reference_forward(x, params)
    assert out.shape == (B, 1), out.shape
    assert jnp.allclose(out, ref, atol=1e-5, rtol=1e-5), "f32 mismatch vs reference"

    # 2) multi-step grid + batch padding (B not a multiple of the tile)
    B2 = 272
    x2 = jax.random.normal(kx2, (B2, input_size), jnp.float32)
    out2 = discriminator_wass_forward(x2, params, block_b=128)
    out2 = jax.block_until_ready(out2)
    ref2 = reference_forward(x2, params)
    assert out2.shape == (B2, 1), out2.shape
    assert jnp.allclose(out2, ref2, atol=1e-5, rtol=1e-5), "tiled f32 mismatch"

    # 3) bf16 MXU-operand path (f32 accumulation + f32 elementwise), loose tol
    out3 = discriminator_wass_forward(x2, params, block_b=128,
                                      matmul_dtype=jnp.bfloat16)
    out3 = jax.block_until_ready(out3)
    assert out3.shape == (B2, 1), out3.shape
    assert bool(jnp.all(jnp.isfinite(out3)))
    assert jnp.allclose(out3, ref2, atol=1e-1, rtol=1e-1), "bf16 mismatch"

    # 4) mixed hidden sizes (exercises pack=2 block-diagonal path)
    B3, d_in, h1, h2, h3 = 50, 16, 48, 64, 32
    x3 = jax.random.normal(kx3, (B3, d_in), jnp.float32)
    params3 = (
        init_linear(k5, d_in, h1),
        init_linear(k6, h1, h2),
        init_linear(k7, h2, h3),
        init_linear(k8, h3, 1),
    )
    out4 = discriminator_wass_forward(x3, params3)
    out4 = jax.block_until_ready(out4)
    ref4 = reference_forward(x3, params3)
    assert out4.shape == (B3, 1), out4.shape
    assert jnp.allclose(out4, ref4, atol=1e-5, rtol=1e-5), "mixed-dim mismatch"

    print("KERNEL_OK")
</pallas_src>

<mosaic_0001>
module attributes {stable_mosaic.version = 11 : i64} {
  func.func @disc_wass_kernel(%arg0: i32, %arg1: memref<8x128xf32, #tpu.memory_space<vmem>>, %arg2: memref<128x128xf32, #tpu.memory_space<vmem>>, %arg3: memref<1x128xf32, #tpu.memory_space<vmem>>, %arg4: memref<128x128xf32, #tpu.memory_space<vmem>>, %arg5: memref<1x128xf32, #tpu.memory_space<vmem>>, %arg6: memref<128x128xf32, #tpu.memory_space<vmem>>, %arg7: memref<1x128xf32, #tpu.memory_space<vmem>>, %arg8: memref<128x4xf32, #tpu.memory_space<vmem>>, %arg9: memref<1x4xf32, #tpu.memory_space<vmem>>, %arg10: memref<8x4xf32, #tpu.memory_space<vmem>>) attributes {dimension_semantics = [#tpu.dimension_semantics<parallel>], iteration_bounds = array<i64: 1>, scalar_prefetch = 0 : i64, scratch_operands = 0 : i64, tpu.core_type = #tpu.core_type<tc>, window_params = [{transform_indices = @transform_0, window_bounds = array<i64: 8, 128>}, {pipeline_mode = #tpu.pipeline_mode<synchronous>, transform_indices = @transform_1, window_bounds = array<i64: 128, 128>}, {pipeline_mode = #tpu.pipeline_mode<synchronous>, transform_indices = @transform_2, window_bounds = array<i64: 1, 128>}, {pipeline_mode = #tpu.pipeline_mode<synchronous>, transform_indices = @transform_3, window_bounds = array<i64: 128, 128>}, {pipeline_mode = #tpu.pipeline_mode<synchronous>, transform_indices = @transform_4, window_bounds = array<i64: 1, 128>}, {pipeline_mode = #tpu.pipeline_mode<synchronous>, transform_indices = @transform_5, window_bounds = array<i64: 128, 128>}, {pipeline_mode = #tpu.pipeline_mode<synchronous>, transform_indices = @transform_6, window_bounds = array<i64: 1, 128>}, {pipeline_mode = #tpu.pipeline_mode<synchronous>, transform_indices = @transform_7, window_bounds = array<i64: 128, 4>}, {pipeline_mode = #tpu.pipeline_mode<synchronous>, transform_indices = @transform_8, window_bounds = array<i64: 1, 4>}, {transform_indices = @transform_9, window_bounds = array<i64: 8, 4>}]} {
    %c0 = arith.constant 0 : index
    %c0_0 = arith.constant 0 : index
    %0 = vector.load %arg1[%c0, %c0_0] : memref<8x128xf32, #tpu.memory_space<vmem>>, vector<8x128xf32>
    %c0_1 = arith.constant 0 : index
    %c0_2 = arith.constant 0 : index
    %1 = vector.load %arg2[%c0_1, %c0_2] : memref<128x128xf32, #tpu.memory_space<vmem>>, vector<128x128xf32>
    %cst = arith.constant dense<0.000000e+00> : vector<8x128xf32>
    %2 = tpu.matmul %0, %1, %cst {dimension_numbers = #tpu.dot_dimension_numbers<[1], [0], [0], [1], [0, 0, 1, 1], [], []>} : vector<8x128xf32>, vector<128x128xf32>, vector<8x128xf32> -> vector<8x128xf32>
    %c0_3 = arith.constant 0 : index
    %c0_4 = arith.constant 0 : index
    %3 = vector.load %arg3[%c0_3, %c0_4] : memref<1x128xf32, #tpu.memory_space<vmem>>, vector<1x128xf32>
    %4 = vector.broadcast %3 : vector<1x128xf32> to vector<8x128xf32>
    %5 = arith.addf %2, %4 : vector<8x128xf32>
    %cst_5 = arith.constant 2.000000e-01 : f32
    %6 = vector.broadcast %cst_5 : f32 to vector<8x128xf32>
    %7 = arith.mulf %6, %5 : vector<8x128xf32>
    %8 = arith.maximumf %5, %7 : vector<8x128xf32>
    %c0_6 = arith.constant 0 : index
    %c0_7 = arith.constant 0 : index
    %9 = vector.load %arg4[%c0_6, %c0_7] : memref<128x128xf32, #tpu.memory_space<vmem>>, vector<128x128xf32>
    %cst_8 = arith.constant dense<0.000000e+00> : vector<8x128xf32>
    %10 = tpu.matmul %8, %9, %cst_8 {dimension_numbers = #tpu.dot_dimension_numbers<[1], [0], [0], [1], [0, 0, 1, 1], [], []>} : vector<8x128xf32>, vector<128x128xf32>, vector<8x128xf32> -> vector<8x128xf32>
    %c0_9 = arith.constant 0 : index
    %c0_10 = arith.constant 0 : index
    %11 = vector.load %arg5[%c0_9, %c0_10] : memref<1x128xf32, #tpu.memory_space<vmem>>, vector<1x128xf32>
    %12 = vector.broadcast %11 : vector<1x128xf32> to vector<8x128xf32>
    %13 = arith.addf %10, %12 : vector<8x128xf32>
    %cst_11 = arith.constant 2.000000e-01 : f32
    %14 = vector.broadcast %cst_11 : f32 to vector<8x128xf32>
    %15 = arith.mulf %14, %13 : vector<8x128xf32>
    %16 = arith.maximumf %13, %15 : vector<8x128xf32>
    %c0_12 = arith.constant 0 : index
    %c0_13 = arith.constant 0 : index
    %17 = vector.load %arg6[%c0_12, %c0_13] : memref<128x128xf32, #tpu.memory_space<vmem>>, vector<128x128xf32>
    %cst_14 = arith.constant dense<0.000000e+00> : vector<8x128xf32>
    %18 = tpu.matmul %16, %17, %cst_14 {dimension_numbers = #tpu.dot_dimension_numbers<[1], [0], [0], [1], [0, 0, 1, 1], [], []>} : vector<8x128xf32>, vector<128x128xf32>, vector<8x128xf32> -> vector<8x128xf32>
    %c0_15 = arith.constant 0 : index
    %c0_16 = arith.constant 0 : index
    %19 = vector.load %arg7[%c0_15, %c0_16] : memref<1x128xf32, #tpu.memory_space<vmem>>, vector<1x128xf32>
    %20 = vector.broadcast %19 : vector<1x128xf32> to vector<8x128xf32>
    %21 = arith.addf %18, %20 : vector<8x128xf32>
    %cst_17 = arith.constant 2.000000e-01 : f32
    %22 = vector.broadcast %cst_17 : f32 to vector<8x128xf32>
    %23 = arith.mulf %22, %21 : vector<8x128xf32>
    %24 = arith.maximumf %21, %23 : vector<8x128xf32>
    %c0_18 = arith.constant 0 : index
    %c0_19 = arith.constant 0 : index
    %25 = vector.load %arg8[%c0_18, %c0_19] : memref<128x4xf32, #tpu.memory_space<vmem>>, vector<128x4xf32>
    %cst_20 = arith.constant dense<0.000000e+00> : vector<8x4xf32>
    %26 = tpu.matmul %24, %25, %cst_20 {dimension_numbers = #tpu.dot_dimension_numbers<[1], [0], [0], [1], [0, 0, 1, 1], [], []>} : vector<8x128xf32>, vector<128x4xf32>, vector<8x4xf32> -> vector<8x4xf32>
    %c0_21 = arith.constant 0 : index
    %c0_22 = arith.constant 0 : index
    %27 = vector.load %arg9[%c0_21, %c0_22] : memref<1x4xf32, #tpu.memory_space<vmem>>, vector<1x4xf32>
    %28 = vector.broadcast %27 : vector<1x4xf32> to vector<8x4xf32>
    %29 = arith.addf %26, %28 : vector<8x4xf32>
    %c0_23 = arith.constant 0 : index
    %c0_24 = arith.constant 0 : index
    %30 = vector.load %arg10[%c0_23, %c0_24] : memref<8x4xf32, #tpu.memory_space<vmem>>, vector<8x4xf32>
    tpu.vector_store %arg10[%c0_23, %c0_24], %29 {strides = array<i32>} : memref<8x4xf32, #tpu.memory_space<vmem>>, vector<8x4xf32>,
    return
  }
  func.func @transform_0(%arg0: i32) -> (i32, i32) {
    %c0_i32 = arith.constant 0 : i32
    %c0_i32_0 = arith.constant 0 : i32
    return %arg0, %c0_i32 : i32, i32
  }
  func.func @transform_1(%arg0: i32) -> (i32, i32) {
    %c0_i32 = arith.constant 0 : i32
    %c0_i32_0 = arith.constant 0 : i32
    %c0_i32_1 = arith.constant 0 : i32
    return %c0_i32, %c0_i32_0 : i32, i32
  }
  func.func @transform_2(%arg0: i32) -> (i32, i32) {
    %c0_i32 = arith.constant 0 : i32
    %c0_i32_0 = arith.constant 0 : i32
    %c0_i32_1 = arith.constant 0 : i32
    return %c0_i32, %c0_i32_0 : i32, i32
  }
  func.func @transform_3(%arg0: i32) -> (i32, i32) {
    %c0_i32 = arith.constant 0 : i32
    %c0_i32_0 = arith.constant 0 : i32
    %c0_i32_1 = arith.constant 0 : i32
    return %c0_i32, %c0_i32_0 : i32, i32
  }
  func.func @transform_4(%arg0: i32) -> (i32, i32) {
    %c0_i32 = arith.constant 0 : i32
    %c0_i32_0 = arith.constant 0 : i32
    %c0_i32_1 = arith.constant 0 : i32
    return %c0_i32, %c0_i32_0 : i32, i32
  }
  func.func @transform_5(%arg0: i32) -> (i32, i32) {
    %c0_i32 = arith.constant 0 : i32
    %c0_i32_0 = arith.constant 0 : i32
    %c0_i32_1 = arith.constant 0 : i32
    return %c0_i32, %c0_i32_0 : i32, i32
  }
  func.func @transform_6(%arg0: i32) -> (i32, i32) {
    %c0_i32 = arith.constant 0 : i32
    %c0_i32_0 = arith.constant 0 : i32
    %c0_i32_1 = arith.constant 0 : i32
    return %c0_i32, %c0_i32_0 : i32, i32
  }
  func.func @transform_7(%arg0: i32) -> (i32, i32) {
    %c0_i32 = arith.constant 0 : i32
    %c0_i32_0 = arith.constant 0 : i32
    %c0_i32_1 = arith.constant 0 : i32
    return %c0_i32, %c0_i32_0 : i32, i32
  }
  func.func @transform_8(%arg0: i32) -> (i32, i32) {
    %c0_i32 = arith.constant 0 : i32
    %c0_i32_0 = arith.constant 0 : i32
    %c0_i32_1 = arith.constant 0 : i32
    return %c0_i32, %c0_i32_0 : i32, i32
  }
  func.func @transform_9(%arg0: i32) -> (i32, i32) {
    %c0_i32 = arith.constant 0 : i32
    %c0_i32_0 = arith.constant 0 : i32
    return %arg0, %c0_i32 : i32, i32
  }
}

</mosaic_0001>

<bundles_post_ra>
// kernel: tpu_custom_call.1
= control target key start
LH: loop header
LB: loop body
LE: loop exit
PB: predicated region body
PF: predicated region fallthrough
CT: control target
= control target key end

     0   :  { %14 = vsyncpa [#allocation3], 0  ;;  %s1095_s0 = inlined_call_operand.hbm [shape: f32[8,128], index: 0, kind: input, shape index: {}]   ;;  %s1096_s1 = inlined_call_operand.vmem [shape: f32[128,128], index: 1, kind: input, shape index: {}]   ;;  %s1097_s2 = inlined_call_operand.vmem [shape: f32[1,128], index: 2, kind: input, shape index: {}]   ;;  %s1098_s3 = inlined_call_operand.hbm [shape: f32[128,128], index: 3, kind: input, shape index: {}]   ;;  %s1099_s4 = inlined_call_operand.vmem [shape: f32[1,128], index: 4, kind: input, shape index: {}]   ;;  %s1100_s5 = inlined_call_operand.hbm [shape: f32[128,128], index: 5, kind: input, shape index: {}]   ;;  %s1101_s6 = inlined_call_operand.vmem [shape: f32[1,128], index: 6, kind: input, shape index: {}]   ;;  %s1102_s7 = inlined_call_operand.vmem [shape: f32[128,4], index: 7, kind: input, shape index: {}]   ;;  %s1103_s8 = inlined_call_operand.vmem [shape: f32[1,4], index: 8, kind: input, shape index: {}]   ;;  %s1104_s9 = inlined_call_operand.vmem [shape: f32[8,4], index: 9, kind: output, shape index: {}]  }
   0x1   :  { %15 = vsyncpa [#allocation5], 0  ;;  %s844_s30 = smov [#allocation4]   ;;  %s774_s13 = scalar_lea.hbm %s1098_s3, 2048 }
   0x2   :  { %s35_s10 = sshll.u32 %s844_s30, 4  ;;  %p775_p0 = scmp.ne.s32.totalorder %s1098_s3, %s774_s13  ;;  %s36_s10 = int_to_ptr.vmem [resolvable:$true] %s35_s10 }
   0x3   :  { %p778_p1 = scmp.lt.u32.totalorder %s774_s13, %s1098_s3 }
   0x5   :  { %p780_p2 = pnand %p778_p1, %p775_p0 }
   0x7   :  { %783 = shalt.err (!%p780_p2)
}
   0x8   :  { %s784_s18 = scalar_lea.vmem %s36_s10, 2048  ;;  %p789_p4 = scmp.lt.s32.totalorder %s36_s10, %s36_s10 }
   0x9   :  { %p785_p3 = scmp.ne.s32.totalorder %s36_s10, %s784_s18  ;;  %p790_p5 = scmp.lt.s32.totalorder %s784_s18, %s784_s18 }
   0xb   :  { %p791_p6 = por %p790_p5, %p789_p4 }
   0xd   :  { %p792_p7 = pnand %p791_p6, %p785_p3 }
   0xf   :  { %795 = shalt.err (!%p792_p7)
}
  0x10   :  { %s845_s19 = smov 128   ;;  %s846_s20 = smov 8  }
  0x11   :  { %41 = dma.hbm_to_vmem [thread:$0]  %s1098_s3, 2048, %s36_s10, [#allocation5], %s845_s19, %s845_s19, %s846_s20  }
  0x12   :  { %s847_s23 = smov [#allocation2]   ;;  %s848_s25 = smov [#allocation6]  }
  0x13   :  { %s22_s24 = sshll.u32 %s847_s23, 4  ;;  %s49_s26 = sshll.u32 %s848_s25, 4  ;;  %s23_s24 = int_to_ptr.vmem [resolvable:$true] %s22_s24  ;;  %s50_s26 = int_to_ptr.vmem [resolvable:$true] %s49_s26 }
  0x14   :  { %s796_s29 = scalar_lea.hbm %s1095_s0, 128 }
  0x15   :  { %p797_p8 = scmp.ne.s32.totalorder %s1095_s0, %s796_s29  ;;  %p800_p9 = scmp.lt.u32.totalorder %s796_s29, %s1095_s0 }
  0x17   :  { %p802_p10 = pnand %p800_p9, %p797_p8 }
  0x19   :  { %805 = shalt.err (!%p802_p10)
}
  0x1a   :  { %s806_s3 = scalar_lea.vmem %s23_s24, 128  ;;  %p811_p12 = scmp.lt.s32.totalorder %s23_s24, %s23_s24 }
  0x1b   :  { %p807_p11 = scmp.ne.s32.totalorder %s23_s24, %s806_s3  ;;  %p812_p13 = scmp.lt.s32.totalorder %s806_s3, %s806_s3 }
  0x1d   :  { %p813_p0 = por %p812_p13, %p811_p12 }
  0x1f   :  { %p814_p1 = pnand %p813_p0, %p807_p11 }
  0x21   :  { %817 = shalt.err (!%p814_p1)
}
  0x22   :  { %25 = dma.hbm_to_vmem [thread:$0]  %s1095_s0, 128, %s23_s24, [#allocation3]  }
  0x23   :  { %s818_s17 = scalar_lea.hbm %s1100_s5, 2048 }
  0x24   :  { %p819_p2 = scmp.ne.s32.totalorder %s1100_s5, %s818_s17  ;;  %p822_p3 = scmp.lt.u32.totalorder %s818_s17, %s1100_s5 }
  0x26   :  { %p824_p4 = pnand %p822_p3, %p819_p2 }
  0x28   :  { %827 = shalt.err (!%p824_p4)
}
  0x29   :  { %s828_s25 = scalar_lea.vmem %s50_s26, 2048  ;;  %p833_p6 = scmp.lt.s32.totalorder %s50_s26, %s50_s26 }
  0x2a   :  { %p829_p5 = scmp.ne.s32.totalorder %s50_s26, %s828_s25  ;;  %p834_p7 = scmp.lt.s32.totalorder %s828_s25, %s828_s25 }
  0x2c   :  { %p835_p8 = por %p834_p7, %p833_p6 }
  0x2e   :  { %p836_p9 = pnand %p835_p8, %p829_p5 }
  0x30   :  { %839 = shalt.err (!%p836_p9)
}
  0x31   :  { %55 = dma.hbm_to_vmem [thread:$0]  %s1100_s5, 2048, %s50_s26, [#allocation5], %s845_s19, %s845_s19, %s846_s20  }
  0x32   :  { %840 = dma.done.wait [#allocation3], 128  }
  0x33   :  { %841 = vsyncadd [#allocation3], 4294967168 }
  0x34   :  { %842 = dma.done.wait [#allocation5], 4096  }
  0x35   :  { %843 = vsyncadd [#allocation5], 4294963200  ;;  %v849_v0 = vmov 0.0|0.0   ;;  %vm850_vm0 = vmmov 0   ;;  %v851_v1 = vmov 0.0   ;;  %v72_v2 = vld [vmem:[%s1096_s1] sm:$0xff] }
  0x36   :  { %670 = vmatprep.subr.bf16.mxu0 %v849_v0  ;;  %562 = vmatprep.mubr.msk.f32.mxu0 %vm850_vm0, %v851_v1  ;;  %v73_v3 = vld [vmem:[%s1096_s1 + $0x8] sm:$0xff]  ;;  %v74_v4 = vld [vmem:[%s1096_s1 + $0x10] sm:$0xff]  ;;  %v75_v6 = vld [vmem:[%s1096_s1 + $0x18] sm:$0xff]  ;;  %vm450_vm1 = vcmask 31744  }
  0x37   :  { %694 = vmatprep.subr.bf16.mxu1 %v849_v0  ;;  %597 = vmatprep.mubr.msk.f32.mxu1 %vm850_vm0, %v851_v1  ;;  %v671_v5 = vpack.c.bf16 %v73_v3, %v72_v2  ;;  %v674_v7 = vpack.c.bf16 %v75_v6, %v74_v4  ;;  %v76_v8 = vld [vmem:[%s1096_s1 + $0x20] sm:$0xff]  ;;  %v77_v9 = vld [vmem:[%s1096_s1 + $0x28] sm:$0xff]  ;;  %v168_v11 = vld [vmem:[#allocation4 + $0x8] sm:$0xff] }
  0x38   :  { %v167_v10 = vld [vmem:[#allocation4] sm:$0xff]  ;;  %v169_v12 = vld [vmem:[#allocation4 + $0x10] sm:$0xff]  ;;  %v170_v13 = vld [vmem:[#allocation4 + $0x18] sm:$0xff]  ;;  %v677_v14 = vpack.c.bf16 %v77_v9, %v76_v8 }
  0x39   :  { %672 = vmatpush3.bf16.msra.mxu0 %v671_v5  ;;  %v695_v15 = vpack.c.bf16 %v168_v11, %v167_v10  ;;  %v78_v16 = vld [vmem:[%s1096_s1 + $0x30] sm:$0xff]  ;;  %v79_v17 = vld [vmem:[%s1096_s1 + $0x38] sm:$0xff]  ;;  %v698_v18 = vpack.c.bf16 %v170_v13, %v169_v12  ;;  %v171_v19 = vld [vmem:[#allocation4 + $0x20] sm:$0xff] }
  0x3a   :  { %673 = vmatprep.subr.bf16.mxu0 %v849_v0  ;;  %v172_v20 = vld [vmem:[#allocation4 + $0x28] sm:$0xff]  ;;  %v680_v21 = vpack.c.bf16 %v79_v17, %v78_v16  ;;  %v80_v22 = vld [vmem:[%s1096_s1 + $0x40] sm:$0xff]  ;;  %v81_v23 = vld [vmem:[%s1096_s1 + $0x48] sm:$0xff] }
  0x3b   :  { %696 = vmatpush3.bf16.msra.mxu1 %v695_v15  ;;  %v701_v24 = vpack.c.bf16 %v172_v20, %v171_v19  ;;  %v173_v25 = vld [vmem:[#allocation4 + $0x30] sm:$0xff]  ;;  %v174_v26 = vld [vmem:[#allocation4 + $0x38] sm:$0xff]  ;;  %v683_v27 = vpack.c.bf16 %v81_v23, %v80_v22  ;;  %v82_v28 = vld [vmem:[%s1096_s1 + $0x50] sm:$0xff] }
  0x3c   :  { %697 = vmatprep.subr.bf16.mxu1 %v849_v0  ;;  %v83_v29 = vld [vmem:[%s1096_s1 + $0x58] sm:$0xff]  ;;  %v704_v30 = vpack.c.bf16 %v174_v26, %v173_v25  ;;  %v175_v31 = vld [vmem:[#allocation4 + $0x40] sm:$0xff]  ;;  %v176_v32 = vld [vmem:[#allocation4 + $0x48] sm:$0xff] }
  0x3d   :  { %675 = vmatpush3.bf16.msra.mxu0 %v674_v7  ;;  %v686_v33 = vpack.c.bf16 %v83_v29, %v82_v28  ;;  %v84_v34 = vld [vmem:[%s1096_s1 + $0x60] sm:$0xff]  ;;  %v85_v35 = vld [vmem:[%s1096_s1 + $0x68] sm:$0xff]  ;;  %v707_v36 = vpack.c.bf16 %v176_v32, %v175_v31  ;;  %v177_v37 = vld [vmem:[#allocation4 + $0x50] sm:$0xff] }
  0x3e   :  { %676 = vmatprep.subr.bf16.mxu0 %v849_v0  ;;  %v178_v38 = vld [vmem:[#allocation4 + $0x58] sm:$0xff]  ;;  %v689_v39 = vpack.c.bf16 %v85_v35, %v84_v34  ;;  %v86_v40 = vld [vmem:[%s1096_s1 + $0x70] sm:$0xff]  ;;  %v87_v41 = vld [vmem:[%s1096_s1 + $0x78] sm:$0xff] }
  0x3f   :  { %699 = vmatpush3.bf16.msra.mxu1 %v698_v18  ;;  %v710_v42 = vpack.c.bf16 %v178_v38, %v177_v37  ;;  %v692_v43 = vpack.c.bf16 %v87_v41, %v86_v40  ;;  %v71_v44 = vld [vmem:[#allocation2] sm:$0xff]  ;;  %v179_v45 = vld [vmem:[#allocation4 + $0x60] sm:$0xff]  ;;  %v180_v46 = vld [vmem:[#allocation4 + $0x68] sm:$0xff] }
  0x40   :  { %700 = vmatprep.subr.bf16.mxu1 %v849_v0  ;;  %v713_v47 = vpack.c.bf16 %v180_v46, %v179_v45  ;;  %v181_v48 = vld [vmem:[#allocation4 + $0x70] sm:$0xff]  ;;  %v182_v49 = vld [vmem:[#allocation4 + $0x78] sm:$0xff]  ;;  %v262_v51 = vld [vmem:[#allocation6] sm:$0xff] }
  0x41   :  { %678 = vmatpush3.bf16.msra.mxu0 %v677_v14  ;;  %v716_v50 = vpack.c.bf16 %v182_v49, %v181_v48  ;;  %v263_v52 = vld [vmem:[#allocation6 + $0x8] sm:$0xff]  ;;  %v264_v53 = vld [vmem:[#allocation6 + $0x10] sm:$0xff]  ;;  %v265_v55 = vld [vmem:[#allocation6 + $0x18] sm:$0xff] }
  0x42   :  { %679 = vmatprep.subr.bf16.mxu0 %v849_v0  ;;  %v719_v54 = vpack.c.bf16 %v263_v52, %v262_v51  ;;  %v722_v56 = vpack.c.bf16 %v265_v55, %v264_v53  ;;  %v266_v57 = vld [vmem:[#allocation6 + $0x20] sm:$0xff]  ;;  %v267_v58 = vld [vmem:[#allocation6 + $0x28] sm:$0xff]  ;;  %v268_v60 = vld [vmem:[#allocation6 + $0x30] sm:$0xff] }
  0x43   :  { %702 = vmatpush3.bf16.msra.mxu1 %v701_v24  ;;  %v725_v59 = vpack.c.bf16 %v267_v58, %v266_v57  ;;  %v269_v61 = vld [vmem:[#allocation6 + $0x38] sm:$0xff]  ;;  %v270_v63 = vld [vmem:[#allocation6 + $0x40] sm:$0xff]  ;;  %v271_v2 = vld [vmem:[#allocation6 + $0x48] sm:$0xff] }
  0x44   :  { %703 = vmatprep.subr.bf16.mxu1 %v849_v0  ;;  %v728_v62 = vpack.c.bf16 %v269_v61, %v268_v60  ;;  %v731_v3 = vpack.c.bf16 %v271_v2, %v270_v63  ;;  %v272_v4 = vld [vmem:[#allocation6 + $0x50] sm:$0xff]  ;;  %v273_v5 = vld [vmem:[#allocation6 + $0x58] sm:$0xff]  ;;  %v274_v13 = vld [vmem:[#allocation6 + $0x60] sm:$0xff] }
  0x45   :  { %681 = vmatpush3.bf16.msra.mxu0 %v680_v21  ;;  %v734_v6 = vpack.c.bf16 %v273_v5, %v272_v4  ;;  %v458_v7 = vld [vmem:[%s1097_s2] ss:$0 sm:$0xff]  ;;  %v275_v14 = vld [vmem:[#allocation6 + $0x68] sm:$0xff]  ;;  %v276_v16 = vld [vmem:[#allocation6 + $0x70] sm:$0xff] }
  0x46   :  { %682 = vmatprep.subr.bf16.mxu0 %v849_v0  ;;  %v737_v15 = vpack.c.bf16 %v275_v14, %v274_v13  ;;  %v277_v17 = vld [vmem:[#allocation6 + $0x78] sm:$0xff]  ;;  %v358_v20 = vld [vmem:[%s1102_s7 + $0x8] sm:$0xff]  ;;  %v360_v22 = vld [vmem:[%s1102_s7 + $0x18] sm:$0xff] }
  0x47   :  { %705 = vmatpush3.bf16.msra.mxu1 %v704_v30  ;;  %v740_v18 = vpack.c.bf16 %v277_v17, %v276_v16  ;;  %v357_v19 = vld [vmem:[%s1102_s7] sm:$0xff]  ;;  %v362_v25 = vld [vmem:[%s1102_s7 + $0x28] sm:$0xff]  ;;  %v364_v28 = vld [vmem:[%s1102_s7 + $0x38] sm:$0xff] }
  0x48   :  { %706 = vmatprep.subr.bf16.mxu1 %v849_v0  ;;  %v743_v21 = vpack.c.bf16 %v358_v20, %v357_v19  ;;  %v361_v24 = vld [vmem:[%s1102_s7 + $0x20] sm:$0xff]  ;;  %v366_v31 = vld [vmem:[%s1102_s7 + $0x48] sm:$0xff]  ;;  %v368_v34 = vld [vmem:[%s1102_s7 + $0x58] sm:$0xff] }
  0x49   :  { %684 = vmatpush3.bf16.msra.mxu0 %v683_v27  ;;  %v749_v26 = vpack.c.bf16 %v362_v25, %v361_v24  ;;  %v363_v27 = vld [vmem:[%s1102_s7 + $0x30] sm:$0xff]  ;;  %v365_v30 = vld [vmem:[%s1102_s7 + $0x40] sm:$0xff]  ;;  %v372_v46 = vld [vmem:[%s1102_s7 + $0x78] sm:$0xff] }
  0x4a   :  { %685 = vmatprep.subr.bf16.mxu0 %v849_v0  ;;  %v752_v29 = vpack.c.bf16 %v364_v28, %v363_v27  ;;  %v755_v32 = vpack.c.bf16 %v366_v31, %v365_v30  ;;  %v371_v45 = vld [vmem:[%s1102_s7 + $0x70] sm:$0xff]  ;;  %v460_v48 = vld [vmem:[%s1101_s6] ss:$0 sm:$0xff] }
  0x4b   :  { %708 = vmatpush3.bf16.msra.mxu1 %v707_v36  ;;  %v459_v36 = vld [vmem:[%s1099_s4] ss:$0 sm:$0xff] }
  0x4c   :  { %709 = vmatprep.subr.bf16.mxu1 %v849_v0 }
  0x4d   :  { %687 = vmatpush3.bf16.msra.mxu0 %v686_v33  ;;  %v367_v33 = vld [vmem:[%s1102_s7 + $0x50] sm:$0xff] }
  0x4e   :  { %688 = vmatprep.subr.bf16.mxu0 %v849_v0  ;;  %v758_v35 = vpack.c.bf16 %v368_v34, %v367_v33 }
  0x4f   :  { %711 = vmatpush3.bf16.msra.mxu1 %v710_v42  ;;  %v369_v42 = vld [vmem:[%s1102_s7 + $0x60] sm:$0xff] }
  0x50   :  { %712 = vmatprep.subr.bf16.mxu1 %v849_v0 }
  0x51   :  { %690 = vmatpush3.bf16.msra.mxu0 %v689_v39 }
  0x52   :  { %691 = vmatprep.subr.bf16.mxu0 %v849_v0 }
  0x53   :  { %714 = vmatpush3.bf16.msra.mxu1 %v713_v47  ;;  %v764_v47 = vpack.c.bf16 %v372_v46, %v371_v45 }
  0x54   :  { %715 = vmatprep.subr.bf16.mxu1 %v849_v0 }
  0x55   :  { %693 = vmatpush3.bf16.msra.mxu0 %v692_v43  ;;  %v370_v43 = vld [vmem:[%s1102_s7 + $0x68] sm:$0xff] }
  0x56   :  { %718 = vmatprep.subr.bf16.mxu0 %v849_v0 }
  0x57   :  { %717 = vmatpush3.bf16.msra.mxu1 %v716_v50 }
  0x58   :  { %563 = vmatmul.mubr.f32.vlgmr.msra.gmra.mrb[0].mxu0 %v71_v44  ;;  %742 = vmatprep.subr.bf16.mxu1 %v849_v0  ;;  %v761_v44 = vpack.c.bf16 %v370_v43, %v369_v42 }
  0x59   :  { %632 = vmatprep.mubr.msk.f32.mxu0 %vm850_vm0, %v851_v1  ;;  %720 = vmatpush3.bf16.msra.mxu0 %v719_v54 }
  0x5a   :  { %721 = vmatprep.subr.bf16.mxu0 %v849_v0 }
  0x5d   :  { %723 = vmatpush3.bf16.msra.mxu0 %v722_v56 }
  0x5e   :  { %724 = vmatprep.subr.bf16.mxu0 %v849_v0 }
  0x61   :  { %726 = vmatpush3.bf16.msra.mxu0 %v725_v59 }
  0x62   :  { %727 = vmatprep.subr.bf16.mxu0 %v849_v0 }
  0x65   :  { %729 = vmatpush3.bf16.msra.mxu0 %v728_v62 }
  0x66   :  { %730 = vmatprep.subr.bf16.mxu0 %v849_v0 }
  0x69   :  { %732 = vmatpush3.bf16.msra.mxu0 %v731_v3 }
  0x6a   :  { %733 = vmatprep.subr.bf16.mxu0 %v849_v0 }
  0x6d   :  { %735 = vmatpush3.bf16.msra.mxu0 %v734_v6 }
  0x6e   :  { %736 = vmatprep.subr.bf16.mxu0 %v849_v0 }
  0x71   :  { %738 = vmatpush3.bf16.msra.mxu0 %v737_v15 }
  0x72   :  { %739 = vmatprep.subr.bf16.mxu0 %v849_v0 }
  0x75   :  { %741 = vmatpush3.bf16.msra.mxu0 %v740_v18 }
 0x12b   :  { %v161_v8 = vpop.f32.mrb[0].mxu0 }
 0x12c   :  { %v162_v9 = vadd.f32 %v458_v7, %v161_v8  ;;  %v564_v10 = vpop.f32.mrb[1].mxu0 }
 0x12e   :  { %v165_v11 = vmul.f32 0.2, %v162_v9 }
 0x130   :  { %v166_v12 = vmax.f32 %v162_v9, %v165_v11 }
 0x132   :  { %598 = vmatmul.mubr.f32.vlgmr.msra.gmra.mrb[0].mxu1 %v166_v12 }
 0x133   :  { %667 = vmatprep.mubr.msk.f32.mxu1 %vm850_vm0, %v851_v1  ;;  %v359_v1 = vld [vmem:[%s1102_s7 + $0x10] sm:$0xff]  ;;  %744 = vmatpush3.bf16.msra.mxu1 %v743_v21 }
 0x134   :  { %v746_v23 = vpack.c.bf16 %v360_v22, %v359_v1  ;;  %745 = vmatprep.subr.bf16.mxu1 %v849_v0 }
 0x137   :  { %747 = vmatpush3.bf16.msra.mxu1 %v746_v23 }
 0x138   :  { %748 = vmatprep.subr.bf16.mxu1 %v849_v0 }
 0x13b   :  { %750 = vmatpush3.bf16.msra.mxu1 %v749_v26 }
 0x13c   :  { %751 = vmatprep.subr.bf16.mxu1 %v849_v0 }
 0x13f   :  { %753 = vmatpush3.bf16.msra.mxu1 %v752_v29 }
 0x140   :  { %754 = vmatprep.subr.bf16.mxu1 %v849_v0 }
 0x143   :  { %756 = vmatpush3.bf16.msra.mxu1 %v755_v32 }
 0x144   :  { %757 = vmatprep.subr.bf16.mxu1 %v849_v0 }
 0x147   :  { %759 = vmatpush3.bf16.msra.mxu1 %v758_v35 }
 0x148   :  { %760 = vmatprep.subr.bf16.mxu1 %v849_v0 }
 0x14b   :  { %762 = vmatpush3.bf16.msra.mxu1 %v761_v44 }
 0x14c   :  { %763 = vmatprep.subr.bf16.mxu1 %v849_v0  ;;  %v461_v0 = vld [vmem:[%s1103_s8] ss:$0 sm:$0xff] }
 0x14f   :  { %765 = vmatpush3.bf16.msra.mxu1 %v764_v47 }
 0x205   :  { %v256_v37 = vpop.f32.mrb[0].mxu1 }
 0x206   :  { %v257_v38 = vadd.f32 %v459_v36, %v256_v37  ;;  %v599_v39 = vpop.f32.mrb[1].mxu1 }
 0x208   :  { %v260_v40 = vmul.f32 0.2, %v257_v38 }
 0x20a   :  { %v261_v41 = vmax.f32 %v257_v38, %v260_v40 }
 0x20c   :  { %633 = vmatmul.mubr.f32.vlgmr.msra.gmra.mrb[2].mxu0 %v261_v41 }
 0x2df   :  { %v351_v49 = vpop.f32.mrb[2].mxu0 }
 0x2e0   :  { %v352_v50 = vadd.f32 %v460_v48, %v351_v49  ;;  %v634_v51 = vpop.f32.mrb[3].mxu0 }
 0x2e2   :  { %v355_v52 = vmul.f32 0.2, %v352_v50 }
 0x2e4   :  { %v356_v53 = vmax.f32 %v352_v50, %v355_v52 }
 0x2e6   :  { %668 = vmatmul.mubr.f32.vlgmr.msra.gmra.mrb[2].mxu1 %v356_v53 }
 0x3b9   :  { %v446_v54 = vpop.f32.mrb[2].mxu1 }
 0x3ba   :  { %v447_v55 = vadd.f32 %v461_v0, %v446_v54  ;;  %v669_v56 = vpop.f32.mrb[3].mxu1 }
 0x3bc   :  { %451 = vst.msk [vmem:[%s1104_s9] sm:$0xff] %vm450_vm1, %v447_v55 }
 0x3bd   :  { %456 = vsyncpa [#allocation3], 1 }
 0x3be   :  { %457 = vsyncpa [#allocation5], 1 }

</bundles_post_ra>
